<compile_context>
chip_gen: v7x
topology: tpu7x:2x2x1
jax: 0.10.0
libtpu: 0.0.40
codegen_flags: <defaults>
</compile_context>

<pallas_src>
import math
import functools

import jax
import jax.numpy as jnp
from jax.experimental import pallas as pl
from jax.experimental.pallas import tpu as pltpu


def _maron_1to1_kernel(x_ref, c0_ref, c1m_ref, b_ref, e_ref, et_ref, o_ref,
                       *, pool_lanes_first):
    # x_ref:  (D, TL)   lane-dense input tile (TL = TN*m lanes, TN whole sets), x.dtype
    # c0_ref: (S, D)    identity-op coeffs, x.dtype
    # c1m_ref:(S, D)    sum-op coeffs pre-scaled by 1/m, x.dtype
    # b_ref:  (S, 1)    bias, f32
    # e_ref:  (TN, TL)  set-expansion matrix, E[n, l] = 1 iff l // m == n, x.dtype
    # et_ref: (TL, TN)  its transpose (pooling matrix), x.dtype
    # o_ref:  (S, TL)   lane-dense output tile
    x2 = x_ref[...]
    cdt = x2.dtype

    # Identity basis op: single lane-dense MXU matmul, f32 accumulation.
    out = jnp.dot(c0_ref[...], x2, preferred_element_type=jnp.float32)        # (S, TL)

    # Normalized-sum basis op is rank-1 per set: compute a per-set correction,
    # choosing the cheaper contraction order.
    if pool_lanes_first:
        # D <= S: pool lanes first (x2 @ E^T), then contract D.
        rs = jnp.dot(x2, et_ref[...], preferred_element_type=jnp.float32)     # (D, TN)
        corr = jnp.dot(c1m_ref[...], rs.astype(cdt),
                       preferred_element_type=jnp.float32)                    # (S, TN)
    else:
        # S < D: contract D first, then pool lanes.
        proj = jnp.dot(c1m_ref[...], x2, preferred_element_type=jnp.float32)  # (S, TL)
        corr = jnp.dot(proj.astype(cdt), et_ref[...],
                       preferred_element_type=jnp.float32)                    # (S, TN)

    # Bias folded into the per-set correction (each lane belongs to exactly one set,
    # so adding it here and expanding is exact).
    corr = corr + b_ref[...]

    # Expand the per-set correction over the m lanes of each set and add.
    out = out + jnp.dot(corr.astype(cdt), e_ref[...],
                        preferred_element_type=jnp.float32)

    o_ref[...] = out.astype(o_ref.dtype)


def _choose_lane_tile(total_lanes: int, m: int, itemsize: int) -> int:
    """Lane tile: a multiple of lcm(m, 128) (whole sets, 128-lane aligned), capped at
    1024 lanes for 4-byte dtypes / 2048 for <=2-byte dtypes, and never larger than the
    problem rounded up to one base tile."""
    base = (m * 128) // math.gcd(m, 128)            # lcm(m, 128)
    cap = 2048 if itemsize <= 2 else 1024
    max_mult = max(1, cap // base)
    need_mult = max(1, -(-total_lanes // base))     # ceil(total_lanes / base)
    return base * min(max_mult, need_mult)


@jax.jit
def maron_equiv_1to1(x, coeffs, bias):
    """x: (N, D, m); coeffs: (D, S, 2); bias: (1, S, 1) -> (N, S, m)."""
    N, D, m = x.shape
    S = coeffs.shape[1]
    xdt = x.dtype
    itemsize = jnp.dtype(xdt).itemsize

    L = N * m
    TL = _choose_lane_tile(L, m, itemsize)
    TN = TL // m
    L_pad = -(-L // TL) * TL
    grid = L_pad // TL

    # Layout plumbing (XLA side): lane-dense (D, N*m) view of x, zero-padded to L_pad.
    # Padded lanes form whole zero sets; they only ever produce bias values, which are
    # sliced away below.
    # TODO(synk): keep the (D, N*m)/(S, N*m) lane-dense layout across adjacent layers
    # so these transposes fuse away instead of adding HBM round-trips.
    x2 = jnp.transpose(x, (1, 0, 2)).reshape(D, L)
    if L_pad != L:
        x2 = jnp.pad(x2, ((0, 0), (0, L_pad - L)))

    # Pre-laid-out parameters: transpose, fold 1/m into c1, flatten bias.
    c0 = coeffs[:, :, 0].T.astype(xdt)                            # (S, D)
    c1m = (coeffs[:, :, 1].T / float(m)).astype(xdt)              # (S, D)
    b = bias.reshape(S, 1).astype(jnp.float32)                    # (S, 1)

    # Set pooling / expansion matrices; 0/1 entries so x.dtype (incl. bf16) is exact.
    lane = jnp.arange(TL, dtype=jnp.int32)
    grp = jnp.arange(TN, dtype=jnp.int32)
    groups = lane[None, :] // m == grp[:, None]                   # (TN, TL) bool
    e = groups.astype(xdt)                                        # expansion
    et = groups.T.astype(xdt)                                     # pooling

    kernel = functools.partial(_maron_1to1_kernel, pool_lanes_first=(D <= S))

    # Advisory cost: identity matmul + 0/1 pooling/expansion matmuls dominate.
    flops = 2 * L_pad * (S * D + (min(D, S) + S) * TN) + 2 * grid * S * D * TN
    bytes_accessed = itemsize * (L_pad * (D + S) + 2 * TN * TL + 2 * S * D) + 4 * S

    out2 = pl.pallas_call(
        kernel,
        out_shape=jax.ShapeDtypeStruct((S, L_pad), xdt),
        grid_spec=pltpu.PrefetchScalarGridSpec(
            num_scalar_prefetch=0,
            grid=(grid,),
            in_specs=[
                pl.BlockSpec((D, TL), lambda i: (0, i)),    # x2: streamed over lane tiles
                pl.BlockSpec((S, D), lambda i: (0, 0)),     # c0: resident
                pl.BlockSpec((S, D), lambda i: (0, 0)),     # c1m: resident
                pl.BlockSpec((S, 1), lambda i: (0, 0)),     # bias: resident
                pl.BlockSpec((TN, TL), lambda i: (0, 0)),   # E: resident
                pl.BlockSpec((TL, TN), lambda i: (0, 0)),   # E^T: resident
            ],
            out_specs=pl.BlockSpec((S, TL), lambda i: (0, i)),
        ),
        compiler_params=pltpu.CompilerParams(
            dimension_semantics=("parallel",),
        ),
        cost_estimate=pl.CostEstimate(
            flops=int(flops), transcendentals=0, bytes_accessed=int(bytes_accessed)),
    )(x2, c0, c1m, b, e, et)

    # Undo the lane-dense packing: (S, L_pad) -> (N, S, m).
    return jnp.transpose(out2[:, :L].reshape(S, N, m), (1, 0, 2))


def _reference(x, coeffs, bias):
    """Pure-JAX reference mirroring the PyTorch module exactly."""
    m = x.shape[-1]
    op1 = x
    op2 = jnp.broadcast_to(jnp.sum(x, axis=2, keepdims=True), x.shape) / float(m)
    ops_out = jnp.stack([op1, op2], axis=2)                       # (N, D, 2, m)
    out = jnp.einsum('dsb,ndbi->nsi', coeffs, ops_out)
    return out + bias


if __name__ == "__main__":
    # Small shapes consistent with the module: batch=2, in_features=4,
    # out_features=8, set size m=16.
    N, D, S, m = 2, 4, 8, 16

    key = jax.random.PRNGKey(0)
    kx, kc = jax.random.split(key)

    x = jax.random.normal(kx, (N, D, m), dtype=jnp.float32)

    # Deterministic parameter init matching MaronLinear1to1.__init__:
    # coeffs ~ N(0,1) * sqrt(2/(D+S)), bias = zeros(1, S, 1).
    coeffs = jax.random.normal(kc, (D, S, 2), dtype=jnp.float32) * math.sqrt(
        2.0 / float(D + S)
    )
    bias = jnp.zeros((1, S, 1), dtype=jnp.float32)

    out = maron_equiv_1to1(x, coeffs, bias)
    out = jax.block_until_ready(out)

    ref = _reference(x, coeffs, bias)
    assert out.shape == (N, S, m)
    assert jnp.allclose(out, ref, atol=1e-5, rtol=1e-5), (
        f"max abs err {jnp.max(jnp.abs(out - ref))}"
    )

    print("KERNEL_OK")
</pallas_src>

<mosaic_0001>
module attributes {stable_mosaic.version = 11 : i64} {
  func.func @_maron_1to1_kernel(%arg0: i32, %arg1: memref<4x128xf32, #tpu.memory_space<vmem>>, %arg2: memref<8x4xf32, #tpu.memory_space<vmem>>, %arg3: memref<8x4xf32, #tpu.memory_space<vmem>>, %arg4: memref<8x1xf32, #tpu.memory_space<vmem>>, %arg5: memref<8x128xf32, #tpu.memory_space<vmem>>, %arg6: memref<128x8xf32, #tpu.memory_space<vmem>>, %arg7: memref<8x128xf32, #tpu.memory_space<vmem>>) attributes {dimension_semantics = [#tpu.dimension_semantics<parallel>], iteration_bounds = array<i64: 1>, scalar_prefetch = 0 : i64, scratch_operands = 0 : i64, tpu.core_type = #tpu.core_type<tc>, window_params = [{transform_indices = @transform_0, window_bounds = array<i64: 4, 128>}, {pipeline_mode = #tpu.pipeline_mode<synchronous>, transform_indices = @transform_1, window_bounds = array<i64: 8, 4>}, {pipeline_mode = #tpu.pipeline_mode<synchronous>, transform_indices = @transform_2, window_bounds = array<i64: 8, 4>}, {pipeline_mode = #tpu.pipeline_mode<synchronous>, transform_indices = @transform_3, window_bounds = array<i64: 8, 1>}, {pipeline_mode = #tpu.pipeline_mode<synchronous>, transform_indices = @transform_4, window_bounds = array<i64: 8, 128>}, {pipeline_mode = #tpu.pipeline_mode<synchronous>, transform_indices = @transform_5, window_bounds = array<i64: 128, 8>}, {transform_indices = @transform_6, window_bounds = array<i64: 8, 128>}]} {
    %c0 = arith.constant 0 : index
    %c0_0 = arith.constant 0 : index
    %0 = vector.load %arg1[%c0, %c0_0] : memref<4x128xf32, #tpu.memory_space<vmem>>, vector<4x128xf32>
    %c0_1 = arith.constant 0 : index
    %c0_2 = arith.constant 0 : index
    %1 = vector.load %arg2[%c0_1, %c0_2] : memref<8x4xf32, #tpu.memory_space<vmem>>, vector<8x4xf32>
    %cst = arith.constant dense<0.000000e+00> : vector<8x128xf32>
    %2 = tpu.matmul %1, %0, %cst {dimension_numbers = #tpu.dot_dimension_numbers<[1], [0], [0], [1], [0, 0, 1, 1], [], []>} : vector<8x4xf32>, vector<4x128xf32>, vector<8x128xf32> -> vector<8x128xf32>
    %c0_3 = arith.constant 0 : index
    %c0_4 = arith.constant 0 : index
    %3 = vector.load %arg6[%c0_3, %c0_4] : memref<128x8xf32, #tpu.memory_space<vmem>>, vector<128x8xf32>
    %cst_5 = arith.constant dense<0.000000e+00> : vector<4x8xf32>
    %4 = tpu.matmul %0, %3, %cst_5 {dimension_numbers = #tpu.dot_dimension_numbers<[1], [0], [0], [1], [0, 0, 1, 1], [], []>} : vector<4x128xf32>, vector<128x8xf32>, vector<4x8xf32> -> vector<4x8xf32>
    %c0_6 = arith.constant 0 : index
    %c0_7 = arith.constant 0 : index
    %5 = vector.load %arg3[%c0_6, %c0_7] : memref<8x4xf32, #tpu.memory_space<vmem>>, vector<8x4xf32>
    %cst_8 = arith.constant dense<0.000000e+00> : vector<8x8xf32>
    %6 = tpu.matmul %5, %4, %cst_8 {dimension_numbers = #tpu.dot_dimension_numbers<[1], [0], [0], [1], [0, 0, 1, 1], [], []>} : vector<8x4xf32>, vector<4x8xf32>, vector<8x8xf32> -> vector<8x8xf32>
    %c0_9 = arith.constant 0 : index
    %c0_10 = arith.constant 0 : index
    %7 = vector.load %arg4[%c0_9, %c0_10] : memref<8x1xf32, #tpu.memory_space<vmem>>, vector<8x1xf32>
    %8 = vector.broadcast %7 : vector<8x1xf32> to vector<8x8xf32>
    %9 = arith.addf %6, %8 : vector<8x8xf32>
    %c0_11 = arith.constant 0 : index
    %c0_12 = arith.constant 0 : index
    %10 = vector.load %arg5[%c0_11, %c0_12] : memref<8x128xf32, #tpu.memory_space<vmem>>, vector<8x128xf32>
    %cst_13 = arith.constant dense<0.000000e+00> : vector<8x128xf32>
    %11 = tpu.matmul %9, %10, %cst_13 {dimension_numbers = #tpu.dot_dimension_numbers<[1], [0], [0], [1], [0, 0, 1, 1], [], []>} : vector<8x8xf32>, vector<8x128xf32>, vector<8x128xf32> -> vector<8x128xf32>
    %12 = arith.addf %2, %11 : vector<8x128xf32>
    %c0_14 = arith.constant 0 : index
    %c0_15 = arith.constant 0 : index
    %13 = vector.load %arg7[%c0_14, %c0_15] : memref<8x128xf32, #tpu.memory_space<vmem>>, vector<8x128xf32>
    tpu.vector_store %arg7[%c0_14, %c0_15], %12 {strides = array<i32>} : memref<8x128xf32, #tpu.memory_space<vmem>>, vector<8x128xf32>,
    return
  }
  func.func @transform_0(%arg0: i32) -> (i32, i32) {
    %c0_i32 = arith.constant 0 : i32
    %c0_i32_0 = arith.constant 0 : i32
    return %c0_i32, %arg0 : i32, i32
  }
  func.func @transform_1(%arg0: i32) -> (i32, i32) {
    %c0_i32 = arith.constant 0 : i32
    %c0_i32_0 = arith.constant 0 : i32
    %c0_i32_1 = arith.constant 0 : i32
    return %c0_i32, %c0_i32_0 : i32, i32
  }
  func.func @transform_2(%arg0: i32) -> (i32, i32) {
    %c0_i32 = arith.constant 0 : i32
    %c0_i32_0 = arith.constant 0 : i32
    %c0_i32_1 = arith.constant 0 : i32
    return %c0_i32, %c0_i32_0 : i32, i32
  }
  func.func @transform_3(%arg0: i32) -> (i32, i32) {
    %c0_i32 = arith.constant 0 : i32
    %c0_i32_0 = arith.constant 0 : i32
    %c0_i32_1 = arith.constant 0 : i32
    return %c0_i32, %c0_i32_0 : i32, i32
  }
  func.func @transform_4(%arg0: i32) -> (i32, i32) {
    %c0_i32 = arith.constant 0 : i32
    %c0_i32_0 = arith.constant 0 : i32
    %c0_i32_1 = arith.constant 0 : i32
    return %c0_i32, %c0_i32_0 : i32, i32
  }
  func.func @transform_5(%arg0: i32) -> (i32, i32) {
    %c0_i32 = arith.constant 0 : i32
    %c0_i32_0 = arith.constant 0 : i32
    %c0_i32_1 = arith.constant 0 : i32
    return %c0_i32, %c0_i32_0 : i32, i32
  }
  func.func @transform_6(%arg0: i32) -> (i32, i32) {
    %c0_i32 = arith.constant 0 : i32
    %c0_i32_0 = arith.constant 0 : i32
    return %c0_i32, %arg0 : i32, i32
  }
}

</mosaic_0001>

<bundles_post_ra>
// kernel: maron_equiv_1to1.1
= control target key start
LH: loop header
LB: loop body
LE: loop exit
PB: predicated region body
PF: predicated region fallthrough
CT: control target
= control target key end

     0   :  { %v461_v0 = vmov 0.0|0.0   ;;  %vm462_vm0 = vmmov 0   ;;  %v463_v4 = vmov 0.0   ;;  %v464_v27 = vmov 0   ;;  %s581_s5 = inlined_call_operand.vmem [shape: f32[128,8], index: 5, kind: input, shape index: {}]   ;;  %s582_s0 = inlined_call_operand.vmem [shape: f32[4,128], index: 0, kind: input, shape index: {}]   ;;  %s583_s3 = inlined_call_operand.vmem [shape: f32[8,1], index: 3, kind: input, shape index: {}]   ;;  %s584_s2 = inlined_call_operand.vmem [shape: f32[8,4], index: 2, kind: input, shape index: {}]   ;;  %s585_s4 = inlined_call_operand.vmem [shape: f32[8,128], index: 4, kind: input, shape index: {}]   ;;  %s586_s1 = inlined_call_operand.vmem [shape: f32[8,4], index: 1, kind: input, shape index: {}]   ;;  %s587_s6 = inlined_call_operand.vmem [shape: f32[8,128], index: 6, kind: output, shape index: {}]  }
   0x1   :  { %430 = vmatprep.subr.bf16.mxu0 %v461_v0  ;;  %v25_v1 = vld [vmem:[%s581_s5] sm:$0xff]  ;;  %v26_v2 = vld [vmem:[%s581_s5 + $0x8] sm:$0xff]  ;;  %v27_v3 = vld [vmem:[%s581_s5 + $0x10] sm:$0xff]  ;;  %412 = vmatprep.mubr.msk.f32.mxu0 %vm462_vm0, %v463_v4  ;;  %vm122_vm1 = vcmask 1043456   ;;  %vm118_vm2 = vcmask 31744   ;;  %vm197_vm3 = vcmask 64512  }
   0x2   :  { %v431_v5 = vpack.c.bf16 %v26_v2, %v25_v1  ;;  %v28_v6 = vld [vmem:[%s581_s5 + $0x18] sm:$0xff]  ;;  %415 = vmatprep.subr.mxu1 %v463_v4  ;;  %417 = vmatprep.mubr.msk.f32.mxu1 %vm462_vm0, %v463_v4  ;;  %v29_v8 = vld [vmem:[%s581_s5 + $0x20] sm:$0xff]  ;;  %v30_v9 = vld [vmem:[%s581_s5 + $0x28] sm:$0xff] }
   0x3   :  { %v434_v7 = vpack.c.bf16 %v28_v6, %v27_v3  ;;  %v437_v10 = vpack.c.bf16 %v30_v9, %v29_v8  ;;  %v31_v11 = vld [vmem:[%s581_s5 + $0x30] sm:$0xff]  ;;  %v32_v12 = vld [vmem:[%s581_s5 + $0x38] sm:$0xff]  ;;  %v33_v14 = vld [vmem:[%s581_s5 + $0x40] sm:$0xff]  ;;  %460 = vset.pattern.permute.xlu0 %v464_v27 }
   0x4   :  { %432 = vmatpush3.bf16.msra.mxu0 %v431_v5  ;;  %v440_v13 = vpack.c.bf16 %v32_v12, %v31_v11  ;;  %v34_v15 = vld [vmem:[%s581_s5 + $0x48] sm:$0xff]  ;;  %v35_v17 = vld [vmem:[%s581_s5 + $0x50] sm:$0xff]  ;;  %v36_v18 = vld [vmem:[%s581_s5 + $0x58] sm:$0xff] }
   0x5   :  { %433 = vmatprep.subr.bf16.mxu0 %v461_v0  ;;  %v443_v16 = vpack.c.bf16 %v34_v15, %v33_v14  ;;  %v446_v19 = vpack.c.bf16 %v36_v18, %v35_v17  ;;  %v37_v20 = vld [vmem:[%s581_s5 + $0x60] sm:$0xff]  ;;  %v38_v21 = vld [vmem:[%s581_s5 + $0x68] sm:$0xff]  ;;  %v39_v23 = vld [vmem:[%s581_s5 + $0x70] sm:$0xff] }
   0x6   :  { %v449_v22 = vpack.c.bf16 %v38_v21, %v37_v20  ;;  %v40_v24 = vld [vmem:[%s581_s5 + $0x78] sm:$0xff]  ;;  %v23_v26 = vld [vmem:[%s582_s0] sm:$0xf] }
   0x7   :  { %v452_v25 = vpack.c.bf16 %v40_v24, %v39_v23  ;;  %v112_v28 = vld [vmem:[%s583_s3] sm:$0xff] }
   0x8   :  { %435 = vmatpush3.bf16.msra.mxu0 %v434_v7  ;;  %115 = vperm.xlu0 %460, %v112_v28   ;;  %v111_v29 = vld [vmem:[%s584_s2] sm:$0xff] }
   0x9   :  { %436 = vmatprep.subr.bf16.mxu0 %v461_v0  ;;  %v196_v31 = vld [vmem:[%s585_s4] sm:$0xff] }
   0xa   :  { %v24_v37 = vld [vmem:[%s586_s1] sm:$0xff] }
   0xc   :  { %438 = vmatpush3.bf16.msra.mxu0 %v437_v10 }
   0xd   :  { %439 = vmatprep.subr.bf16.mxu0 %v461_v0 }
  0x10   :  { %441 = vmatpush3.bf16.msra.mxu0 %v440_v13 }
  0x11   :  { %442 = vmatprep.subr.bf16.mxu0 %v461_v0 }
  0x14   :  { %444 = vmatpush3.bf16.msra.mxu0 %v443_v16 }
  0x15   :  { %445 = vmatprep.subr.bf16.mxu0 %v461_v0 }
  0x18   :  { %447 = vmatpush3.bf16.msra.mxu0 %v446_v19 }
  0x19   :  { %448 = vmatprep.subr.bf16.mxu0 %v461_v0 }
  0x1c   :  { %450 = vmatpush3.bf16.msra.mxu0 %v449_v22 }
  0x1d   :  { %451 = vmatprep.subr.bf16.mxu0 %v461_v0 }
  0x20   :  { %453 = vmatpush3.bf16.msra.mxu0 %v452_v25 }
  0x23   :  { %413 = vmatmul.mubr.f32.vlgmr.msra.gmra.mrb[0].mxu0 %v23_v26 }
  0x87   :  { %v116_v33 = vpop.permute.xlu0 %115 }
  0xf6   :  { %v107_v30 = vpop.f32.mrb[0].mxu0 }
  0xf7   :  { %v414_v32 = vpop.f32.mrb[1].mxu0  ;;  %416 = vmatpush3.msk.msra.mxu1 %vm122_vm1, %v107_v30 }
  0xf8   :  { %418 = vmatmul.mubr.msk.f32.vlgmr.msra.gmra.mrb[0].mxu1 %vm118_vm2, %v111_v29  ;;  %420 = vmatprep.subr.mxu1 %v463_v4 }
  0xf9   :  { %421 = vmatpush3.msra.mxu1 %v196_v31  ;;  %422 = vmatprep.mubr.msk.f32.mxu1 %vm462_vm0, %v463_v4 }
  0xfa   :  { %425 = vmatprep.subr.mxu1 %v463_v4 }
 0x1cb   :  { %v192_v34 = vpop.f32.mrb[0].mxu1 }
 0x1cc   :  { %v193_v35 = vadd.f32 %v192_v34, %v116_v33  ;;  %v419_v36 = vpop.f32.mrb[1].mxu1 }
 0x1ce   :  { %423 = vmatmul.mubr.msk.f32.vlgmr.msra.gmra.mrb[2].mxu1 %vm197_vm3, %v193_v35 }
 0x1cf   :  { %426 = vmatpush3.msk.msra.mxu1 %vm122_vm1, %v23_v26  ;;  %427 = vmatprep.mubr.msk.f32.mxu1 %vm462_vm0, %v463_v4 }
 0x1d6   :  { %428 = vmatmul.mubr.msk.f32.vlgmr.msra.gmra.mrb[2].mxu1 %vm118_vm2, %v24_v37 }
 0x2a9   :  { %v343_v38 = vpop.f32.mrb[2].mxu1 }
 0x2aa   :  { %347 = vst [vmem:[%s587_s6] sm:$0xff] %v343_v38  ;;  %v429_v39 = vpop.f32.mrb[3].mxu1 }

</bundles_post_ra>
